<compile_context>
chip_gen: v7x
topology: tpu7x:2x2x1
jax: 0.10.0
libtpu: 0.0.40
codegen_flags: <defaults>
</compile_context>

<pallas_src>
import functools

import jax
import jax.numpy as jnp
from jax import lax
from jax.experimental import pallas as pl
from jax.experimental.pallas import tpu as pltpu

BN_EPS = 1e-5
VMEM_SPEC = pl.BlockSpec(memory_space=pltpu.MemorySpace.VMEM)


# ----------------------------------------------------------------------------
# Fused kernel
# ----------------------------------------------------------------------------
def _fused_forward_kernel(ids_ref, quals_ref, tableT_ref, qb_ref, *rest,
                          filter_sizes, seq_len, n_valid, eps):
    """Fused embed+qual -> (conv+bn+relu)* -> dense, all in (C, B*L) layout."""
    n_conv = len(filter_sizes)
    conv_refs = rest[:3 * n_conv]
    dw_ref, db_ref, out_ref = rest[3 * n_conv:]

    N = ids_ref.shape[1]                                   # padded B*L (lanes)
    L = seq_len
    E, Vp1 = tableT_ref.shape
    V = Vp1 - 1                                            # true vocab size

    # ---- Fused embedding + Linear(1->E)(quals): one MXU dot (K = V+1) -------
    ids_row = ids_ref[...]                                 # (1, N) int32
    quals_row = quals_ref[...]                             # (1, N) f32
    iota_v = lax.broadcasted_iota(jnp.int32, (Vp1, N), 0)
    onehot = (iota_v == ids_row).astype(jnp.float32)       # row V never hit
    aug = jnp.where(iota_v == V, quals_row, onehot)        # (V+1, N)
    x = jnp.maximum(
        jnp.dot(tableT_ref[...], aug, preferred_element_type=jnp.float32)
        + qb_ref[...], 0.0)                                # (E, N)

    # per-lane position inside its own sequence (lane n holds (b, l), n=b*L+l)
    lane = lax.broadcasted_iota(jnp.int32, (1, N), 1)
    l_idx = lane % L

    # hoisted + deduped 'same'-padding edge masks, one per tap offset d != 0
    offsets = set()
    for fs in filter_sizes:
        left = (fs - 1) // 2                               # PyTorch 'same' pad
        offsets.update(t - left for t in range(fs))
    offsets.discard(0)
    edge_mask = {
        d: jnp.logical_and(l_idx + d >= 0, l_idx + d < L).astype(jnp.float32)
        for d in sorted(offsets)
    }

    padded = (n_valid != N)
    if padded:
        valid = (lane < n_valid).astype(jnp.float32)       # (1, N)
    inv_n = jnp.float32(1.0 / n_valid)

    # ---- Conv1d('same', no bias) + BatchNorm1d(train stats) + ReLU stack ----
    for c in range(n_conv):
        w_ref, g_ref, be_ref = conv_refs[3 * c: 3 * c + 3]
        fs = filter_sizes[c]
        left = (fs - 1) // 2

        # tap-accumulation: fs dots of K=Cin accumulated in f32 (no im2col)
        y = None
        for t in range(fs):                                # static tap loop
            d = t - left
            if d == 0:
                xt = x
            else:
                # XLU lane rotation; cross-batch / wrapped lanes zeroed by the
                # precomputed edge mask, emulating zero padding.
                xt = pltpu.roll(x, shift=(-d) % N, axis=1) * edge_mask[d]
            acc = jnp.dot(w_ref[t], xt, preferred_element_type=jnp.float32)
            y = acc if y is None else y + acc              # (Cout, N)

        if padded:
            y = y * valid                                  # pad lanes -> 0

        # training-mode BN, single fused pass:
        #   scale = gamma * rsqrt(var + eps), bias = beta - mean*scale
        s1 = jnp.sum(y, axis=1, keepdims=True) * inv_n      # E[y]
        s2 = jnp.sum(y * y, axis=1, keepdims=True) * inv_n  # E[y^2]
        var = s2 - s1 * s1
        scale = g_ref[...] * lax.rsqrt(var + eps)           # (Cout, 1)
        bias = be_ref[...] - s1 * scale
        x = jnp.maximum(y * scale + bias, 0.0)               # one FMA + max

    # ---- Dense head (lane-dense (ncls, N) store) -----------------------------
    out_ref[...] = jnp.dot(dw_ref[...], x,
                           preferred_element_type=jnp.float32) + db_ref[...]


# ----------------------------------------------------------------------------
# Wrapper
# ----------------------------------------------------------------------------
def benchmark_cnn_forward(params, input_ids, input_quals):
    B, L = input_ids.shape
    N = B * L
    N_pad = max(128, ((N + 127) // 128) * 128)             # lane-dense N
    pad = N_pad - N

    table = params["emb_table"]                            # (V, E)
    V, E = table.shape
    ncls = params["dense_w"].shape[1]
    filter_sizes = tuple(int(l["w"].shape[0]) for l in params["conv_layers"])

    # Flatten positions onto the lane axis; channels on sublanes.
    ids_row = input_ids.reshape(1, N).astype(jnp.int32)
    quals_row = input_quals.reshape(1, N).astype(jnp.float32)
    if pad:
        ids_row = jnp.pad(ids_row, ((0, 0), (0, pad)))
        quals_row = jnp.pad(quals_row, ((0, 0), (0, pad)))

    # fused [embedding | qual-linear] weight: (E, V+1), last column = qual_w
    tableT_aug = jnp.concatenate(
        [jnp.transpose(table, (1, 0)),
         jnp.transpose(params["qual_w"], (1, 0))], axis=1)  # (E, V+1)
    qb = jnp.transpose(params["qual_b"], (1, 0))            # (E, 1)

    args = [ids_row, quals_row, tableT_aug, qb]
    flops = 2 * E * (V + 1) * N_pad
    cin = E
    for lyr in params["conv_layers"]:
        fs, _, cout = lyr["w"].shape
        # per-tap weight (fs, Cout, Cin); conv bias dropped (cancelled by BN)
        w_taps = jnp.transpose(lyr["w"], (0, 2, 1))
        args += [w_taps,
                 lyr["gamma"].reshape(cout, 1),
                 lyr["beta"].reshape(cout, 1)]
        flops += 2 * cout * fs * cin * N_pad
        cin = cout
    dw = jnp.transpose(params["dense_w"], (1, 0))            # (ncls, C)
    db = params["dense_b"].reshape(ncls, 1)
    args += [dw, db]
    flops += 2 * ncls * cin * N_pad

    bytes_in = int(sum(int(a.size) * a.dtype.itemsize for a in args))
    bytes_out = ncls * N_pad * 4
    # rough peak live intermediates: activations + a few rolled taps + aug
    max_c = max([E] + [int(l["w"].shape[2]) for l in params["conv_layers"]])
    peak = (E + 3 * max_c + (V + 1) + 8) * N_pad * 4
    vmem_limit = int(min(max(2 * (bytes_in + bytes_out + peak), 16 << 20),
                         64 << 20))
    transcendentals = int(sum(int(l["gamma"].size)
                              for l in params["conv_layers"]))

    out = pl.pallas_call(
        functools.partial(_fused_forward_kernel,
                          filter_sizes=filter_sizes, seq_len=L,
                          n_valid=N, eps=BN_EPS),
        out_shape=jax.ShapeDtypeStruct((ncls, N_pad), jnp.float32),
        in_specs=[VMEM_SPEC] * len(args),
        out_specs=VMEM_SPEC,
        compiler_params=pltpu.CompilerParams(vmem_limit_bytes=vmem_limit),
        cost_estimate=pl.CostEstimate(flops=flops,
                                      transcendentals=transcendentals,
                                      bytes_accessed=bytes_in + bytes_out),
    )(*args)

    # (ncls, N_pad) -> drop pad lanes -> (B, L, ncls) PyTorch output layout.
    out = out[:, :N]
    return jnp.transpose(out.reshape(ncls, B, L), (1, 2, 0))


# ----------------------------------------------------------------------------
# Plain-JAX reference (same math, no Pallas) for a correctness check
# ----------------------------------------------------------------------------
def reference_forward(params, ids, quals):
    emb = params["emb_table"][ids]                         # (B, L, E)
    q = quals[..., None] * params["qual_w"] + params["qual_b"]
    x = jax.nn.relu(emb + q)
    for layer in params["conv_layers"]:
        fs = layer["w"].shape[0]
        left = (fs - 1) // 2
        right = (fs - 1) - left
        y = lax.conv_general_dilated(
            x, layer["w"], window_strides=(1,), padding=[(left, right)],
            dimension_numbers=("NWC", "WIO", "NWC"))
        y = y + layer["b"]
        mean = y.mean(axis=(0, 1), keepdims=True)
        var = ((y - mean) ** 2).mean(axis=(0, 1), keepdims=True)
        y = (y - mean) * lax.rsqrt(var + BN_EPS)
        x = jax.nn.relu(y * layer["gamma"] + layer["beta"])
    return x @ params["dense_w"] + params["dense_b"]


# ----------------------------------------------------------------------------
# Main
# ----------------------------------------------------------------------------
if __name__ == "__main__":
    # Small shapes consistent with the module.
    B, L = 2, 128
    vocab_size = 8
    embedding_dim = 32
    num_filters = [16, 8]
    filter_sizes = [3, 5]
    number_of_classes = 2

    key = jax.random.PRNGKey(0)
    keys = iter(jax.random.split(key, 32))

    def rnd(shape, scale=0.1):
        return (scale * jax.random.normal(next(keys), shape)).astype(jnp.float32)

    params = {
        "emb_table": rnd((vocab_size, embedding_dim), 1.0),
        "qual_w": rnd((1, embedding_dim)),   # Linear(1, E) weight, (in, out)
        "qual_b": rnd((1, embedding_dim)),
        "conv_layers": [],
        "dense_w": rnd((num_filters[-1], number_of_classes)),
        "dense_b": rnd((1, number_of_classes)),
    }
    in_ch = embedding_dim
    for fs, nf in zip(filter_sizes, num_filters):
        params["conv_layers"].append({
            "w": rnd((fs, in_ch, nf)),       # (tap, Cin, Cout)
            "b": rnd((1, nf)),               # used by reference only (BN cancels)
            "gamma": (1.0 + rnd((1, nf))).astype(jnp.float32),
            "beta": rnd((1, nf)),
        })
        in_ch = nf

    input_ids = jax.random.randint(next(keys), (B, L), 0, vocab_size)
    input_quals = jax.random.uniform(next(keys), (B, L), dtype=jnp.float32)

    out = benchmark_cnn_forward(params, input_ids, input_quals)
    out = jax.block_until_ready(out)

    assert out.shape == (B, L, number_of_classes), out.shape
    ref = reference_forward(params, input_ids, input_quals)
    assert jnp.allclose(out, ref, atol=1e-4, rtol=1e-4), float(jnp.abs(out - ref).max())

    print("KERNEL_OK")
</pallas_src>

<mosaic_0001>
module attributes {stable_mosaic.version = 11 : i64} {
  func.func @_fused_forward_kernel(%arg0: memref<1x256xi32, #tpu.memory_space<vmem>>, %arg1: memref<1x256xf32, #tpu.memory_space<vmem>>, %arg2: memref<32x9xf32, #tpu.memory_space<vmem>>, %arg3: memref<32x1xf32, #tpu.memory_space<vmem>>, %arg4: memref<3x16x32xf32, #tpu.memory_space<vmem>>, %arg5: memref<16x1xf32, #tpu.memory_space<vmem>>, %arg6: memref<16x1xf32, #tpu.memory_space<vmem>>, %arg7: memref<5x8x16xf32, #tpu.memory_space<vmem>>, %arg8: memref<8x1xf32, #tpu.memory_space<vmem>>, %arg9: memref<8x1xf32, #tpu.memory_space<vmem>>, %arg10: memref<2x8xf32, #tpu.memory_space<vmem>>, %arg11: memref<2x1xf32, #tpu.memory_space<vmem>>, %arg12: memref<2x256xf32, #tpu.memory_space<vmem>>) attributes {dimension_semantics = [], scalar_prefetch = 0 : i64, scratch_operands = 0 : i64, tpu.core_type = #tpu.core_type<tc>} {
    %c0 = arith.constant 0 : index
    %c0_0 = arith.constant 0 : index
    %0 = vector.load %arg0[%c0, %c0_0] : memref<1x256xi32, #tpu.memory_space<vmem>>, vector<1x256xi32>
    %c0_1 = arith.constant 0 : index
    %c0_2 = arith.constant 0 : index
    %1 = vector.load %arg1[%c0_1, %c0_2] : memref<1x256xf32, #tpu.memory_space<vmem>>, vector<1x256xf32>
    %2 = tpu.iota {dimensions = array<i32: 0>} : vector<9x256xi32>
    %3 = vector.broadcast %0 : vector<1x256xi32> to vector<9x256xi32>
    %4 = arith.cmpi eq, %2, %3 : vector<9x256xi32>
    %5 = arith.extui %4 : vector<9x256xi1> to vector<9x256xi32>
    %6 = arith.sitofp %5 : vector<9x256xi32> to vector<9x256xf32>
    %c8_i32 = arith.constant 8 : i32
    %7 = vector.broadcast %c8_i32 : i32 to vector<9x256xi32>
    %8 = arith.cmpi eq, %2, %7 : vector<9x256xi32>
    %9 = vector.shape_cast %1 : vector<1x256xf32> to vector<1x256xf32>
    %10 = vector.broadcast %9 : vector<1x256xf32> to vector<9x256xf32>
    %11 = arith.select %8, %10, %6 : vector<9x256xi1>, vector<9x256xf32>
    %c0_3 = arith.constant 0 : index
    %c0_4 = arith.constant 0 : index
    %12 = vector.load %arg2[%c0_3, %c0_4] : memref<32x9xf32, #tpu.memory_space<vmem>>, vector<32x9xf32>
    %cst = arith.constant dense<0.000000e+00> : vector<32x256xf32>
    %13 = tpu.matmul %12, %11, %cst {dimension_numbers = #tpu.dot_dimension_numbers<[1], [0], [0], [1], [0, 0, 1, 1], [], []>} : vector<32x9xf32>, vector<9x256xf32>, vector<32x256xf32> -> vector<32x256xf32>
    %c0_5 = arith.constant 0 : index
    %c0_6 = arith.constant 0 : index
    %14 = vector.load %arg3[%c0_5, %c0_6] : memref<32x1xf32, #tpu.memory_space<vmem>>, vector<32x1xf32>
    %15 = vector.broadcast %14 : vector<32x1xf32> to vector<32x256xf32>
    %16 = arith.addf %13, %15 : vector<32x256xf32>
    %cst_7 = arith.constant 0.000000e+00 : f32
    %17 = vector.broadcast %cst_7 : f32 to vector<32x256xf32>
    %18 = arith.maximumf %16, %17 : vector<32x256xf32>
    %19 = tpu.iota {dimensions = array<i32: 1>} : vector<1x256xi32>
    %c128_i32 = arith.constant 128 : i32
    %c0_i32 = arith.constant 0 : i32
    %20 = arith.cmpi eq, %c128_i32, %c0_i32 : i32
    %c1_i32 = arith.constant 1 : i32
    %21 = arith.select %20, %c1_i32, %c128_i32 : i32
    %22 = vector.broadcast %21 : i32 to vector<1x256xi32>
    %23 = arith.remsi %19, %22 : vector<1x256xi32>
    %c0_i32_8 = arith.constant 0 : i32
    %24 = vector.broadcast %c0_i32_8 : i32 to vector<1x256xi32>
    %25 = arith.cmpi ne, %23, %24 : vector<1x256xi32>
    %c0_i32_9 = arith.constant 0 : i32
    %26 = vector.broadcast %c0_i32_9 : i32 to vector<1x256xi32>
    %27 = arith.cmpi slt, %23, %26 : vector<1x256xi32>
    %c0_i32_10 = arith.constant 0 : i32
    %28 = arith.cmpi slt, %21, %c0_i32_10 : i32
    %29 = vector.broadcast %28 : i1 to vector<1x256xi1>
    %30 = vector.broadcast %29 : vector<1x256xi1> to vector<1x256xi1>
    %31 = arith.xori %27, %30 : vector<1x256xi1>
    %32 = arith.andi %31, %25 : vector<1x256xi1>
    %33 = vector.broadcast %21 : i32 to vector<1x256xi32>
    %34 = arith.addi %23, %33 : vector<1x256xi32>
    %35 = arith.select %32, %34, %23 : vector<1x256xi1>, vector<1x256xi32>
    %c-2_i32 = arith.constant -2 : i32
    %36 = vector.broadcast %c-2_i32 : i32 to vector<1x256xi32>
    %37 = arith.addi %35, %36 : vector<1x256xi32>
    %c0_i32_11 = arith.constant 0 : i32
    %38 = vector.broadcast %c0_i32_11 : i32 to vector<1x256xi32>
    %39 = arith.cmpi sge, %37, %38 : vector<1x256xi32>
    %c-2_i32_12 = arith.constant -2 : i32
    %40 = vector.broadcast %c-2_i32_12 : i32 to vector<1x256xi32>
    %41 = arith.addi %35, %40 : vector<1x256xi32>
    %c128_i32_13 = arith.constant 128 : i32
    %42 = vector.broadcast %c128_i32_13 : i32 to vector<1x256xi32>
    %43 = arith.cmpi slt, %41, %42 : vector<1x256xi32>
    %44 = arith.andi %39, %43 : vector<1x256xi1>
    %45 = arith.extui %44 : vector<1x256xi1> to vector<1x256xi32>
    %46 = arith.sitofp %45 : vector<1x256xi32> to vector<1x256xf32>
    %c-1_i32 = arith.constant -1 : i32
    %47 = vector.broadcast %c-1_i32 : i32 to vector<1x256xi32>
    %48 = arith.addi %35, %47 : vector<1x256xi32>
    %c0_i32_14 = arith.constant 0 : i32
    %49 = vector.broadcast %c0_i32_14 : i32 to vector<1x256xi32>
    %50 = arith.cmpi sge, %48, %49 : vector<1x256xi32>
    %c-1_i32_15 = arith.constant -1 : i32
    %51 = vector.broadcast %c-1_i32_15 : i32 to vector<1x256xi32>
    %52 = arith.addi %35, %51 : vector<1x256xi32>
    %c128_i32_16 = arith.constant 128 : i32
    %53 = vector.broadcast %c128_i32_16 : i32 to vector<1x256xi32>
    %54 = arith.cmpi slt, %52, %53 : vector<1x256xi32>
    %55 = arith.andi %50, %54 : vector<1x256xi1>
    %56 = arith.extui %55 : vector<1x256xi1> to vector<1x256xi32>
    %57 = arith.sitofp %56 : vector<1x256xi32> to vector<1x256xf32>
    %c1_i32_17 = arith.constant 1 : i32
    %58 = vector.broadcast %c1_i32_17 : i32 to vector<1x256xi32>
    %59 = arith.addi %35, %58 : vector<1x256xi32>
    %c0_i32_18 = arith.constant 0 : i32
    %60 = vector.broadcast %c0_i32_18 : i32 to vector<1x256xi32>
    %61 = arith.cmpi sge, %59, %60 : vector<1x256xi32>
    %c1_i32_19 = arith.constant 1 : i32
    %62 = vector.broadcast %c1_i32_19 : i32 to vector<1x256xi32>
    %63 = arith.addi %35, %62 : vector<1x256xi32>
    %c128_i32_20 = arith.constant 128 : i32
    %64 = vector.broadcast %c128_i32_20 : i32 to vector<1x256xi32>
    %65 = arith.cmpi slt, %63, %64 : vector<1x256xi32>
    %66 = arith.andi %61, %65 : vector<1x256xi1>
    %67 = arith.extui %66 : vector<1x256xi1> to vector<1x256xi32>
    %68 = arith.sitofp %67 : vector<1x256xi32> to vector<1x256xf32>
    %c2_i32 = arith.constant 2 : i32
    %69 = vector.broadcast %c2_i32 : i32 to vector<1x256xi32>
    %70 = arith.addi %35, %69 : vector<1x256xi32>
    %c0_i32_21 = arith.constant 0 : i32
    %71 = vector.broadcast %c0_i32_21 : i32 to vector<1x256xi32>
    %72 = arith.cmpi sge, %70, %71 : vector<1x256xi32>
    %c2_i32_22 = arith.constant 2 : i32
    %73 = vector.broadcast %c2_i32_22 : i32 to vector<1x256xi32>
    %74 = arith.addi %35, %73 : vector<1x256xi32>
    %c128_i32_23 = arith.constant 128 : i32
    %75 = vector.broadcast %c128_i32_23 : i32 to vector<1x256xi32>
    %76 = arith.cmpi slt, %74, %75 : vector<1x256xi32>
    %77 = arith.andi %72, %76 : vector<1x256xi1>
    %78 = arith.extui %77 : vector<1x256xi1> to vector<1x256xi32>
    %79 = arith.sitofp %78 : vector<1x256xi32> to vector<1x256xf32>
    %c1_i32_24 = arith.constant 1 : i32
    %80 = tpu.dynamic_rotate %18 by %c1_i32_24 dim 1 : vector<32x256xf32>, i32 -> vector<32x256xf32>
    %81 = vector.broadcast %57 : vector<1x256xf32> to vector<32x256xf32>
    %82 = arith.mulf %80, %81 : vector<32x256xf32>
    %c0_25 = arith.constant 0 : index
    %c0_26 = arith.constant 0 : index
    %c0_27 = arith.constant 0 : index
    %83 = vector.load %arg4[%c0_25, %c0_26, %c0_27] : memref<3x16x32xf32, #tpu.memory_space<vmem>>, vector<1x16x32xf32>
    %84 = vector.shape_cast %83 : vector<1x16x32xf32> to vector<16x32xf32>
    %cst_28 = arith.constant dense<0.000000e+00> : vector<16x256xf32>
    %85 = tpu.matmul %84, %82, %cst_28 {dimension_numbers = #tpu.dot_dimension_numbers<[1], [0], [0], [1], [0, 0, 1, 1], [], []>} : vector<16x32xf32>, vector<32x256xf32>, vector<16x256xf32> -> vector<16x256xf32>
    %c1 = arith.constant 1 : index
    %c0_29 = arith.constant 0 : index
    %c0_30 = arith.constant 0 : index
    %86 = vector.load %arg4[%c1, %c0_29, %c0_30] : memref<3x16x32xf32, #tpu.memory_space<vmem>>, vector<1x16x32xf32>
    %87 = vector.shape_cast %86 : vector<1x16x32xf32> to vector<16x32xf32>
    %cst_31 = arith.constant dense<0.000000e+00> : vector<16x256xf32>
    %88 = tpu.matmul %87, %18, %cst_31 {dimension_numbers = #tpu.dot_dimension_numbers<[1], [0], [0], [1], [0, 0, 1, 1], [], []>} : vector<16x32xf32>, vector<32x256xf32>, vector<16x256xf32> -> vector<16x256xf32>
    %89 = arith.addf %85, %88 : vector<16x256xf32>
    %c255_i32 = arith.constant 255 : i32
    %90 = tpu.dynamic_rotate %18 by %c255_i32 dim 1 : vector<32x256xf32>, i32 -> vector<32x256xf32>
    %91 = vector.broadcast %68 : vector<1x256xf32> to vector<32x256xf32>
    %92 = arith.mulf %90, %91 : vector<32x256xf32>
    %c2 = arith.constant 2 : index
    %c0_32 = arith.constant 0 : index
    %c0_33 = arith.constant 0 : index
    %93 = vector.load %arg4[%c2, %c0_32, %c0_33] : memref<3x16x32xf32, #tpu.memory_space<vmem>>, vector<1x16x32xf32>
    %94 = vector.shape_cast %93 : vector<1x16x32xf32> to vector<16x32xf32>
    %cst_34 = arith.constant dense<0.000000e+00> : vector<16x256xf32>
    %95 = tpu.matmul %94, %92, %cst_34 {dimension_numbers = #tpu.dot_dimension_numbers<[1], [0], [0], [1], [0, 0, 1, 1], [], []>} : vector<16x32xf32>, vector<32x256xf32>, vector<16x256xf32> -> vector<16x256xf32>
    %96 = arith.addf %89, %95 : vector<16x256xf32>
    %cst_35 = arith.constant dense<0.000000e+00> : vector<16xf32>
    %97 = vector.multi_reduction <add>, %96, %cst_35 [1] : vector<16x256xf32> to vector<16xf32>
    %98 = vector.shape_cast %97 : vector<16xf32> to vector<16x1xf32>
    %cst_36 = arith.constant 3.906250e-03 : f32
    %99 = vector.broadcast %cst_36 : f32 to vector<16x1xf32>
    %100 = arith.mulf %98, %99 : vector<16x1xf32>
    %101 = arith.mulf %96, %96 : vector<16x256xf32>
    %cst_37 = arith.constant dense<0.000000e+00> : vector<16xf32>
    %102 = vector.multi_reduction <add>, %101, %cst_37 [1] : vector<16x256xf32> to vector<16xf32>
    %103 = vector.shape_cast %102 : vector<16xf32> to vector<16x1xf32>
    %cst_38 = arith.constant 3.906250e-03 : f32
    %104 = vector.broadcast %cst_38 : f32 to vector<16x1xf32>
    %105 = arith.mulf %103, %104 : vector<16x1xf32>
    %106 = arith.mulf %100, %100 : vector<16x1xf32>
    %107 = arith.subf %105, %106 : vector<16x1xf32>
    %c0_39 = arith.constant 0 : index
    %c0_40 = arith.constant 0 : index
    %108 = vector.load %arg5[%c0_39, %c0_40] : memref<16x1xf32, #tpu.memory_space<vmem>>, vector<16x1xf32>
    %cst_41 = arith.constant 9.99999974E-6 : f32
    %109 = vector.broadcast %cst_41 : f32 to vector<16x1xf32>
    %110 = arith.addf %107, %109 : vector<16x1xf32>
    %111 = math.rsqrt %110 : vector<16x1xf32>
    %112 = arith.mulf %108, %111 : vector<16x1xf32>
    %c0_42 = arith.constant 0 : index
    %c0_43 = arith.constant 0 : index
    %113 = vector.load %arg6[%c0_42, %c0_43] : memref<16x1xf32, #tpu.memory_space<vmem>>, vector<16x1xf32>
    %114 = arith.mulf %100, %112 : vector<16x1xf32>
    %115 = arith.subf %113, %114 : vector<16x1xf32>
    %116 = vector.broadcast %112 : vector<16x1xf32> to vector<16x256xf32>
    %117 = arith.mulf %96, %116 : vector<16x256xf32>
    %118 = vector.broadcast %115 : vector<16x1xf32> to vector<16x256xf32>
    %119 = arith.addf %117, %118 : vector<16x256xf32>
    %cst_44 = arith.constant 0.000000e+00 : f32
    %120 = vector.broadcast %cst_44 : f32 to vector<16x256xf32>
    %121 = arith.maximumf %119, %120 : vector<16x256xf32>
    %c2_i32_45 = arith.constant 2 : i32
    %122 = tpu.dynamic_rotate %121 by %c2_i32_45 dim 1 : vector<16x256xf32>, i32 -> vector<16x256xf32>
    %123 = vector.broadcast %46 : vector<1x256xf32> to vector<16x256xf32>
    %124 = arith.mulf %122, %123 : vector<16x256xf32>
    %c0_46 = arith.constant 0 : index
    %c0_47 = arith.constant 0 : index
    %c0_48 = arith.constant 0 : index
    %125 = vector.load %arg7[%c0_46, %c0_47, %c0_48] : memref<5x8x16xf32, #tpu.memory_space<vmem>>, vector<1x8x16xf32>
    %126 = vector.shape_cast %125 : vector<1x8x16xf32> to vector<8x16xf32>
    %cst_49 = arith.constant dense<0.000000e+00> : vector<8x256xf32>
    %127 = tpu.matmul %126, %124, %cst_49 {dimension_numbers = #tpu.dot_dimension_numbers<[1], [0], [0], [1], [0, 0, 1, 1], [], []>} : vector<8x16xf32>, vector<16x256xf32>, vector<8x256xf32> -> vector<8x256xf32>
    %c1_i32_50 = arith.constant 1 : i32
    %128 = tpu.dynamic_rotate %121 by %c1_i32_50 dim 1 : vector<16x256xf32>, i32 -> vector<16x256xf32>
    %129 = vector.broadcast %57 : vector<1x256xf32> to vector<16x256xf32>
    %130 = arith.mulf %128, %129 : vector<16x256xf32>
    %c1_51 = arith.constant 1 : index
    %c0_52 = arith.constant 0 : index
    %c0_53 = arith.constant 0 : index
    %131 = vector.load %arg7[%c1_51, %c0_52, %c0_53] : memref<5x8x16xf32, #tpu.memory_space<vmem>>, vector<1x8x16xf32>
    %132 = vector.shape_cast %131 : vector<1x8x16xf32> to vector<8x16xf32>
    %cst_54 = arith.constant dense<0.000000e+00> : vector<8x256xf32>
    %133 = tpu.matmul %132, %130, %cst_54 {dimension_numbers = #tpu.dot_dimension_numbers<[1], [0], [0], [1], [0, 0, 1, 1], [], []>} : vector<8x16xf32>, vector<16x256xf32>, vector<8x256xf32> -> vector<8x256xf32>
    %134 = arith.addf %127, %133 : vector<8x256xf32>
    %c2_55 = arith.constant 2 : index
    %c0_56 = arith.constant 0 : index
    %c0_57 = arith.constant 0 : index
    %135 = vector.load %arg7[%c2_55, %c0_56, %c0_57] : memref<5x8x16xf32, #tpu.memory_space<vmem>>, vector<1x8x16xf32>
    %136 = vector.shape_cast %135 : vector<1x8x16xf32> to vector<8x16xf32>
    %cst_58 = arith.constant dense<0.000000e+00> : vector<8x256xf32>
    %137 = tpu.matmul %136, %121, %cst_58 {dimension_numbers = #tpu.dot_dimension_numbers<[1], [0], [0], [1], [0, 0, 1, 1], [], []>} : vector<8x16xf32>, vector<16x256xf32>, vector<8x256xf32> -> vector<8x256xf32>
    %138 = arith.addf %134, %137 : vector<8x256xf32>
    %c255_i32_59 = arith.constant 255 : i32
    %139 = tpu.dynamic_rotate %121 by %c255_i32_59 dim 1 : vector<16x256xf32>, i32 -> vector<16x256xf32>
    %140 = vector.broadcast %68 : vector<1x256xf32> to vector<16x256xf32>
    %141 = arith.mulf %139, %140 : vector<16x256xf32>
    %c3 = arith.constant 3 : index
    %c0_60 = arith.constant 0 : index
    %c0_61 = arith.constant 0 : index
    %142 = vector.load %arg7[%c3, %c0_60, %c0_61] : memref<5x8x16xf32, #tpu.memory_space<vmem>>, vector<1x8x16xf32>
    %143 = vector.shape_cast %142 : vector<1x8x16xf32> to vector<8x16xf32>
    %cst_62 = arith.constant dense<0.000000e+00> : vector<8x256xf32>
    %144 = tpu.matmul %143, %141, %cst_62 {dimension_numbers = #tpu.dot_dimension_numbers<[1], [0], [0], [1], [0, 0, 1, 1], [], []>} : vector<8x16xf32>, vector<16x256xf32>, vector<8x256xf32> -> vector<8x256xf32>
    %145 = arith.addf %138, %144 : vector<8x256xf32>
    %c254_i32 = arith.constant 254 : i32
    %146 = tpu.dynamic_rotate %121 by %c254_i32 dim 1 : vector<16x256xf32>, i32 -> vector<16x256xf32>
    %147 = vector.broadcast %79 : vector<1x256xf32> to vector<16x256xf32>
    %148 = arith.mulf %146, %147 : vector<16x256xf32>
    %c4 = arith.constant 4 : index
    %c0_63 = arith.constant 0 : index
    %c0_64 = arith.constant 0 : index
    %149 = vector.load %arg7[%c4, %c0_63, %c0_64] : memref<5x8x16xf32, #tpu.memory_space<vmem>>, vector<1x8x16xf32>
    %150 = vector.shape_cast %149 : vector<1x8x16xf32> to vector<8x16xf32>
    %cst_65 = arith.constant dense<0.000000e+00> : vector<8x256xf32>
    %151 = tpu.matmul %150, %148, %cst_65 {dimension_numbers = #tpu.dot_dimension_numbers<[1], [0], [0], [1], [0, 0, 1, 1], [], []>} : vector<8x16xf32>, vector<16x256xf32>, vector<8x256xf32> -> vector<8x256xf32>
    %152 = arith.addf %145, %151 : vector<8x256xf32>
    %cst_66 = arith.constant dense<0.000000e+00> : vector<8xf32>
    %153 = vector.multi_reduction <add>, %152, %cst_66 [1] : vector<8x256xf32> to vector<8xf32>
    %154 = vector.shape_cast %153 : vector<8xf32> to vector<8x1xf32>
    %cst_67 = arith.constant 3.906250e-03 : f32
    %155 = vector.broadcast %cst_67 : f32 to vector<8x1xf32>
    %156 = arith.mulf %154, %155 : vector<8x1xf32>
    %157 = arith.mulf %152, %152 : vector<8x256xf32>
    %cst_68 = arith.constant dense<0.000000e+00> : vector<8xf32>
    %158 = vector.multi_reduction <add>, %157, %cst_68 [1] : vector<8x256xf32> to vector<8xf32>
    %159 = vector.shape_cast %158 : vector<8xf32> to vector<8x1xf32>
    %cst_69 = arith.constant 3.906250e-03 : f32
    %160 = vector.broadcast %cst_69 : f32 to vector<8x1xf32>
    %161 = arith.mulf %159, %160 : vector<8x1xf32>
    %162 = arith.mulf %156, %156 : vector<8x1xf32>
    %163 = arith.subf %161, %162 : vector<8x1xf32>
    %c0_70 = arith.constant 0 : index
    %c0_71 = arith.constant 0 : index
    %164 = vector.load %arg8[%c0_70, %c0_71] : memref<8x1xf32, #tpu.memory_space<vmem>>, vector<8x1xf32>
    %cst_72 = arith.constant 9.99999974E-6 : f32
    %165 = vector.broadcast %cst_72 : f32 to vector<8x1xf32>
    %166 = arith.addf %163, %165 : vector<8x1xf32>
    %167 = math.rsqrt %166 : vector<8x1xf32>
    %168 = arith.mulf %164, %167 : vector<8x1xf32>
    %c0_73 = arith.constant 0 : index
    %c0_74 = arith.constant 0 : index
    %169 = vector.load %arg9[%c0_73, %c0_74] : memref<8x1xf32, #tpu.memory_space<vmem>>, vector<8x1xf32>
    %170 = arith.mulf %156, %168 : vector<8x1xf32>
    %171 = arith.subf %169, %170 : vector<8x1xf32>
    %172 = vector.broadcast %168 : vector<8x1xf32> to vector<8x256xf32>
    %173 = arith.mulf %152, %172 : vector<8x256xf32>
    %174 = vector.broadcast %171 : vector<8x1xf32> to vector<8x256xf32>
    %175 = arith.addf %173, %174 : vector<8x256xf32>
    %cst_75 = arith.constant 0.000000e+00 : f32
    %176 = vector.broadcast %cst_75 : f32 to vector<8x256xf32>
    %177 = arith.maximumf %175, %176 : vector<8x256xf32>
    %c0_76 = arith.constant 0 : index
    %c0_77 = arith.constant 0 : index
    %178 = vector.load %arg10[%c0_76, %c0_77] : memref<2x8xf32, #tpu.memory_space<vmem>>, vector<2x8xf32>
    %cst_78 = arith.constant dense<0.000000e+00> : vector<2x256xf32>
    %179 = tpu.matmul %178, %177, %cst_78 {dimension_numbers = #tpu.dot_dimension_numbers<[1], [0], [0], [1], [0, 0, 1, 1], [], []>} : vector<2x8xf32>, vector<8x256xf32>, vector<2x256xf32> -> vector<2x256xf32>
    %c0_79 = arith.constant 0 : index
    %c0_80 = arith.constant 0 : index
    %180 = vector.load %arg11[%c0_79, %c0_80] : memref<2x1xf32, #tpu.memory_space<vmem>>, vector<2x1xf32>
    %181 = vector.broadcast %180 : vector<2x1xf32> to vector<2x256xf32>
    %182 = arith.addf %179, %181 : vector<2x256xf32>
    %c0_81 = arith.constant 0 : index
    %c0_82 = arith.constant 0 : index
    %183 = vector.load %arg12[%c0_81, %c0_82] : memref<2x256xf32, #tpu.memory_space<vmem>>, vector<2x256xf32>
    tpu.vector_store %arg12[%c0_81, %c0_82], %182 {strides = array<i32>} : memref<2x256xf32, #tpu.memory_space<vmem>>, vector<2x256xf32>,
    return
  }
}

</mosaic_0001>

<bundles_post_ra>
// kernel: tpu_custom_call.1
= control target key start
LH: loop header
LB: loop body
LE: loop exit
PB: predicated region body
PF: predicated region fallthrough
CT: control target
= control target key end

     0   :  { %v44_v0 = vlaneseq  ;;  %v1444_v1 = vmov 0.0   ;;  %v1445_v4 = vmov 0   ;;  %s1820_s0 = inlined_call_operand.vmem [shape: s32[1,256], index: 0, kind: input, shape index: {}]   ;;  %s1821_s1 = inlined_call_operand.vmem [shape: f32[1,256], index: 1, kind: input, shape index: {}]   ;;  %s1822_s2 = inlined_call_operand.vmem [shape: f32[32,9], index: 2, kind: input, shape index: {}]   ;;  %s1823_s3 = inlined_call_operand.vmem [shape: f32[32,1], index: 3, kind: input, shape index: {}]   ;;  %s1824_s4 = inlined_call_operand.vmem [shape: f32[3,16,32], index: 4, kind: input, shape index: {}]   ;;  %s1825_s5 = inlined_call_operand.vmem [shape: f32[16,1], index: 5, kind: input, shape index: {}]   ;;  %s1826_s6 = inlined_call_operand.vmem [shape: f32[16,1], index: 6, kind: input, shape index: {}]   ;;  %s1827_s7 = inlined_call_operand.vmem [shape: f32[5,8,16], index: 7, kind: input, shape index: {}]   ;;  %s1828_s8 = inlined_call_operand.vmem [shape: f32[8,1], index: 8, kind: input, shape index: {}]   ;;  %s1829_s9 = inlined_call_operand.vmem [shape: f32[8,1], index: 9, kind: input, shape index: {}]   ;;  %s1830_s10 = inlined_call_operand.vmem [shape: f32[2,8], index: 10, kind: input, shape index: {}]   ;;  %s1831_s11 = inlined_call_operand.vmem [shape: f32[2,1], index: 11, kind: input, shape index: {}]   ;;  %s1832_s12 = inlined_call_operand.hbm [shape: f32[2,256], index: 12, kind: output, shape index: {}]  }
   0x1   :  { %196 = vmatprep.mubr.f32.mxu0 %v1444_v1  ;;  %413 = vmatprep.mubr.f32.mxu1 %v1444_v1  ;;  %v42_v2 = vld [vmem:[%s1820_s0] sm:$0x3]  ;;  %v90_v7 = vld [vmem:[%s1823_s3 + $0x10] sm:$0xff] }
   0x2   :  { %v45_v3 = vshrl.u32 %v44_v0, 7  ;;  %1412 = vset.pattern.permute.xlu0 %v1445_v4  ;;  %v88_v5 = vld [vmem:[%s1823_s3] sm:$0xff]  ;;  %1413 = vset.pattern.permute.xlu1 %v1445_v4 }
   0x3   :  { %v43_v6 = vld [vmem:[%s1821_s1] sm:$0x3]  ;;  %94 = vperm.xlu0 %1412, %v88_v5  }
   0x4   :  { %17 = vsyncpa [#allocation3], 0  ;;  %v46_v8 = vadd.s32 8, %v45_v3  ;;  %v49_v9 = vsub.s32 0, %v45_v3  ;;  %v53_v10 = vsub.s32 1, %v45_v3  ;;  %v89_v11 = vld [vmem:[%s1823_s3 + $0x8] sm:$0xff]  ;;  %104 = vperm.xlu1 %1413, %v90_v7  }
   0x5   :  { %v91_v12 = vld [vmem:[%s1823_s3 + $0x18] sm:$0xff]  ;;  %vm125_vm1 = vcmask 1040384   ;;  %v1446_v21 = vmov 1.0   ;;  %v84_v24 = vld [vmem:[%s1822_s2] sm:$0xff]  ;;  %vm112_vm8 = vcmask 72704   ;;  %v85_v25 = vld [vmem:[%s1822_s2 + $0x8] sm:$0xff] }
   0x6   :  { %v50_v13 = vrot.slane %v42_v2, %v49_v9  ;;  %v54_v14 = vrot.slane %v42_v2, %v53_v10  ;;  %v73_v15 = vrot.slane %v43_v6, %v49_v9  ;;  %vm68_vm0 = vcmp.eq.s32.totalorder %v46_v8, 8  ;;  %v86_v26 = vld [vmem:[%s1822_s2 + $0x10] sm:$0xff]  ;;  %v87_v27 = vld [vmem:[%s1822_s2 + $0x18] sm:$0xff]  ;;  %s1447_s20 = smov 1   ;;  %s1448_s2 = smov 127  }
   0x7   :  { %v77_v16 = vrot.slane %v43_v6, %v53_v10  ;;  %99 = vperm.xlu0 %1412, %v89_v11   ;;  %v1317_v60 = vld [vmem:[%s1824_s4 + $0x10] sm:$0xff]  ;;  %vm342_vm9 = vcmask 261120   ;;  %v1318_v61 = vld [vmem:[%s1824_s4 + $0x18] sm:$0xff]  ;;  %v1585_v62 = vand.u32 127, %v44_v0 }
   0x8   :  { %vm56_vm2 = vcmp.eq.s32.totalorder %v45_v3, %v54_v14  ;;  %vm57_vm3 = vcmp.eq.s32.totalorder %v46_v8, %v50_v13  ;;  %vm58_vm4 = vcmp.eq.s32.totalorder %v46_v8, %v54_v14  ;;  %vm55_vm5 = vcmp.eq.s32.totalorder %v45_v3, %v50_v13  ;;  %109 = vperm.xlu1 %1413, %v91_v12  }
   0x9   :  { %v1299_v17 = vsel %vm57_vm3, 1.0, %v1444_v1  ;;  %v1300_v18 = vsel %vm58_vm4, 1.0, %v1444_v1  ;;  %vm1339_vm6 = vmpackc.low %vm125_vm1, %vm56_vm2  ;;  %v231_v63 = vadd.s32 128, %v1585_v62  ;;  %v268_v6 = vadd.s32 4294967295, %v1585_v62 }
   0xa   :  { %v82_v19 = vsel %vm68_vm0, %v73_v15, %v1299_v17  ;;  %v83_v20 = vsel %vm68_vm0, %v77_v16, %v1300_v18  ;;  %vm1342_vm7 = vmpackc.low %vm125_vm1, %vm55_vm5  ;;  %vm320_vm12 = vcmp.lt.s32.totalorder %v1585_v62, 1  ;;  %vm525_vm14 = vcmp.lt.s32.totalorder %v1585_v62, 127 }
   0xb   :  { %v1338_v22 = vpack.c.bf16 %v83_v20, %v1446_v21  ;;  %v1341_v23 = vpack.c.bf16 %v82_v19, %v1446_v21  ;;  %v1588_v3 = vand.u32 127, %v231_v63  ;;  %vm270_vm10 = vcmp.ge.s32.totalorder %v268_v6, 0 }
   0xc   :  { %v1594_v0 = vsel %vm270_vm10, 1.0, %v1444_v1  ;;  %vm710_vm2 = vcmp.lt.s32.totalorder %v1585_v62, 2  ;;  %vm738_vm3 = vcmask 130048   ;;  %vm1067_vm5 = vcmp.lt.s32.totalorder %v1585_v62, 126 }
   0xd   :  { %1340 = vmatprep.subr.msk.bf16.mxu0 %vm1339_vm6, %v1338_v22  ;;  %v269_v7 = vadd.s32 4294967295, %v1588_v3 }
   0xe   :  { %1343 = vmatpush1.bf16.msk.msra.mxu0 %vm1342_vm7, %v1341_v23  ;;  %vm1196_vm7 = vcmask 64512  }
   0xf   :  { %vm271_vm11 = vcmp.ge.s32.totalorder %v269_v7, 0 }
  0x10   :  { %v1597_v10 = vsel %vm271_vm11, 1.0, %v1444_v1 }
  0x11   :  { %1305 = vmatmul.mubr.msk.f32.vlgmr.msra.gmra.mrb[0].mxu0 %vm112_vm8, %v84_v24 }
  0x12   :  { %202 = vmatprep.mubr.f32.mxu0 %v1444_v1 }
  0x15   :  { %1306 = vmatmul.mubr.msk.f32.gmra.mrb[2].mxu0 %vm112_vm8, %v85_v25  ;;  %v281_v25 = vadd.s32 1, %v1588_v3 }
  0x16   :  { %208 = vmatprep.mubr.f32.mxu0 %v1444_v1 }
  0x17   :  { %vm285_vm13 = vcmp.lt.s32.totalorder %v281_v25, 128 }
  0x19   :  { %1307 = vmatmul.mubr.msk.f32.gmra.mrb[4].mxu0 %vm112_vm8, %v86_v26  ;;  %v280_v26 = vadd.s32 1, %v1585_v62 }
  0x1a   :  { %214 = vmatprep.mubr.f32.mxu0 %v1444_v1 }
  0x1b   :  { %vm284_vm15 = vcmp.lt.s32.totalorder %v280_v26, 128 }
  0x1d   :  { %1308 = vmatmul.mubr.msk.f32.gmra.mrb[6].mxu0 %vm112_vm8, %v87_v27 }
  0x1e   :  { %806 = vmatprep.mubr.f32.mxu0 %v1444_v1 }
  0x82   :  { %v95_v28 = vpop.permute.xlu0 %94 }
  0x83   :  { %v105_v33 = vpop.permute.xlu1 %104 }
  0x86   :  { %v100_v34 = vpop.permute.xlu0 %99 }
  0x87   :  { %v110_v49 = vpop.permute.xlu1 %109 }
  0xe4   :  { %v198_v29 = vpop.f32.mrb[0].mxu0 }
  0xe5   :  { %v199_v30 = vadd.f32 %v198_v29, %v95_v28  ;;  %v200_v31 = vpop.f32.mrb[1].mxu0 }
  0xe6   :  { %v201_v35 = vadd.f32 %v200_v31, %v95_v28 }
  0xe7   :  { %v221_v32 = vmax.f32 %v199_v30, 0.0 }
  0xe8   :  { %v204_v36 = vpop.f32.mrb[2].mxu0  ;;  %v222_v41 = vmax.f32 %v201_v35, 0.0 }
  0xe9   :  { %v205_v37 = vadd.f32 %v204_v36, %v100_v34  ;;  %v206_v38 = vpop.f32.mrb[3].mxu0  ;;  %304 = vrot.lane.b32.xlu0 %v221_v32, %s1447_s20 }
  0xea   :  { %v207_v39 = vadd.f32 %v206_v38, %v100_v34 }
  0xeb   :  { %v223_v40 = vmax.f32 %v205_v37, 0.0 }
  0xec   :  { %v224_v42 = vmax.f32 %v207_v39, 0.0  ;;  %v210_v43 = vpop.f32.mrb[4].mxu0 }
  0xed   :  { %306 = vrot.lane.b32.xlu1 %v223_v40, %s1447_s20  ;;  %509 = vrot.lane.b32.xlu0 %v221_v32, %s1448_s2  ;;  %v211_v44 = vadd.f32 %v210_v43, %v105_v33  ;;  %v212_v45 = vpop.f32.mrb[5].mxu0  ;;  %v1346_v46 = vpack.c.bf16 %v223_v40, %v221_v32  ;;  %v1621_v32 = vsel %vm285_vm13, 1.0, %v1444_v1 }
  0xee   :  { %v1344_v47 = vpack.c.bf16 %v224_v42, %v222_v41  ;;  %v213_v48 = vadd.f32 %v212_v45, %v105_v33 }
  0xef   :  { %v225_v51 = vmax.f32 %v211_v44, 0.0  ;;  %v1637_v44 = vsel %vm284_vm15, 1.0, %v1444_v1 }
  0xf0   :  { %1345 = vmatprep.subr.bf16.mxu1 %v1344_v47  ;;  %v216_v50 = vpop.f32.mrb[6].mxu0  ;;  %v226_v54 = vmax.f32 %v213_v48, 0.0 }
  0xf1   :  { %511 = vrot.lane.b32.xlu1 %v223_v40, %s1448_s2  ;;  %312 = vrot.lane.b32.xlu0 %v222_v41, %s1447_s20  ;;  %v217_v52 = vadd.f32 %v216_v50, %v110_v49  ;;  %v218_v53 = vpop.f32.mrb[7].mxu0 }
  0xf2   :  { %1347 = vmatpush1.bf16.msra.mxu1 %v1346_v46  ;;  %v219_v55 = vadd.f32 %v218_v53, %v110_v49 }
  0xf3   :  { %v227_v56 = vmax.f32 %v217_v52, 0.0 }
  0xf4   :  { %v228_v57 = vmax.f32 %v219_v55, 0.0 }
  0xf5   :  { %314 = vrot.lane.b32.xlu1 %v224_v42, %s1447_s20  ;;  %517 = vrot.lane.b32.xlu0 %v222_v41, %s1448_s2  ;;  %v1350_v58 = vpack.c.bf16 %v227_v56, %v225_v51 }
  0xf6   :  { %v1348_v59 = vpack.c.bf16 %v228_v57, %v226_v54 }
  0xf8   :  { %1349 = vmatprep.subr.bf16.mxu1 %v1348_v59 }
  0xf9   :  { %519 = vrot.lane.b32.xlu1 %v224_v42, %s1448_s2  ;;  %308 = vrot.lane.b32.xlu0 %v225_v51, %s1447_s20 }
  0xfa   :  { %1351 = vmatpush1.bf16.msra.mxu1 %v1350_v58 }
  0xfd   :  { %310 = vrot.lane.b32.xlu1 %v227_v56, %s1447_s20  ;;  %316 = vrot.lane.b32.xlu0 %v226_v54, %s1447_s20 }
  0xfe   :  { %1319 = vmatmul.mubr.msk.f32.vlgmr.msra.gmra.mrb[0].mxu1 %vm342_vm9, %v1317_v60 }
  0xff   :  { %419 = vmatprep.mubr.f32.mxu1 %v1444_v1 }
 0x101   :  { %318 = vrot.lane.b32.xlu1 %v228_v57, %s1447_s20  ;;  %513 = vrot.lane.b32.xlu0 %v225_v51, %s1448_s2 }
 0x102   :  { %1320 = vmatmul.mubr.msk.f32.gmra.mrb[2].mxu1 %vm342_vm9, %v1318_v61 }
 0x103   :  { %496 = vmatprep.mubr.f32.mxu1 %v1444_v1 }
 0x105   :  { %515 = vrot.lane.b32.xlu1 %v227_v56, %s1448_s2  ;;  %521 = vrot.lane.b32.xlu0 %v226_v54, %s1448_s2  ;;  %v337_v56 = vld [vmem:[%s1824_s4] sm:$0xff] }
 0x109   :  { %523 = vrot.lane.b32.xlu1 %v228_v57, %s1448_s2 }
 0x15b   :  { %v305_v2 = vpop.permute.xlu0 %304 }
 0x15f   :  { %v307_v4 = vpop.permute.xlu1 %306  ;;  %v510_v5 = vpop.permute.xlu0 %509 }
 0x163   :  { %v512_v8 = vpop.permute.xlu1 %511  ;;  %v313_v9 = vpop.permute.xlu0 %312 }
 0x164   :  { %v321_v11 = vsel %vm320_vm12, %v305_v2, %v313_v9  ;;  %v325_v12 = vsel %vm320_vm12, %v313_v9, %v305_v2  ;;  %v1324_v9 = vld [vmem:[%s1824_s4 + $0x28] sm:$0xff] }
 0x165   :  { %v329_v17 = vmul.f32 %v1594_v0, %v325_v12  ;;  %v330_v18 = vmul.f32 %v1597_v10, %v321_v11 }
 0x167   :  { %v315_v13 = vpop.permute.xlu1 %314  ;;  %v518_v14 = vpop.permute.xlu0 %517 }
 0x168   :  { %v322_v15 = vsel %vm320_vm12, %v307_v4, %v315_v13  ;;  %v326_v16 = vsel %vm320_vm12, %v315_v13, %v307_v4  ;;  %v530_v33 = vsel %vm525_vm14, %v518_v14, %v510_v5  ;;  %v526_v45 = vsel %vm525_vm14, %v510_v5, %v518_v14  ;;  %v338_v5 = vld [vmem:[%s1824_s4 + $0x8] sm:$0xff] }
 0x169   :  { %v331_v19 = vmul.f32 %v1594_v0, %v326_v16  ;;  %v332_v20 = vmul.f32 %v1597_v10, %v322_v15  ;;  %v535_v46 = vmul.f32 %v1621_v32, %v530_v33  ;;  %v534_v53 = vmul.f32 %v1637_v44, %v526_v45 }
 0x16b   :  { %v1354_v21 = vpack.c.bf16 %v331_v19, %v329_v17  ;;  %v520_v22 = vpop.permute.xlu1 %519  ;;  %v309_v23 = vpop.permute.xlu0 %308  ;;  %v1352_v24 = vpack.c.bf16 %v332_v20, %v330_v18 }
 0x16c   :  { %v531_v29 = vsel %vm525_vm14, %v520_v22, %v512_v8  ;;  %v527_v36 = vsel %vm525_vm14, %v512_v8, %v520_v22  ;;  %v1323_v8 = vld [vmem:[%s1824_s4 + $0x20] sm:$0xff] }
 0x16d   :  { %1353 = vmatprep.subr.bf16.mxu1 %v1352_v24  ;;  %v537_v37 = vmul.f32 %v1621_v32, %v531_v29  ;;  %v536_v51 = vmul.f32 %v1637_v44, %v527_v36 }
 0x16e   :  { %1355 = vmatpush1.bf16.msra.mxu1 %v1354_v21 }
 0x16f   :  { %v311_v27 = vpop.permute.xlu1 %310  ;;  %v317_v28 = vpop.permute.xlu0 %316  ;;  %v1360_v52 = vpack.c.bf16 %v537_v37, %v535_v46  ;;  %v1362_v58 = vpack.c.bf16 %v536_v51, %v534_v53 }
 0x170   :  { %v323_v30 = vsel %vm320_vm12, %v309_v23, %v317_v28  ;;  %v327_v31 = vsel %vm320_vm12, %v317_v28, %v309_v23 }
 0x171   :  { %v333_v40 = vmul.f32 %v1594_v0, %v327_v31  ;;  %v334_v41 = vmul.f32 %v1597_v10, %v323_v30 }
 0x173   :  { %v319_v34 = vpop.permute.xlu1 %318  ;;  %v514_v35 = vpop.permute.xlu0 %513 }
 0x174   :  { %v324_v38 = vsel %vm320_vm12, %v311_v27, %v319_v34  ;;  %v328_v39 = vsel %vm320_vm12, %v319_v34, %v311_v27 }
 0x175   :  { %v335_v42 = vmul.f32 %v1594_v0, %v328_v39  ;;  %v336_v43 = vmul.f32 %v1597_v10, %v324_v38  ;;  %v656_v38 = vld [vmem:[%s1825_s5] sm:$0xff] }
 0x177   :  { %v1358_v47 = vpack.c.bf16 %v335_v42, %v333_v40  ;;  %v516_v48 = vpop.permute.xlu1 %515  ;;  %v522_v49 = vpop.permute.xlu0 %521  ;;  %v1356_v50 = vpack.c.bf16 %v336_v43, %v334_v41  ;;  %v664_v41 = vld [vmem:[%s1826_s6] sm:$0xff]  ;;  %v657_v42 = vld [vmem:[%s1825_s5 + $0x8] sm:$0xff]  ;;  %s1449_s5 = smov 2  }
 0x178   :  { %v528_v54 = vsel %vm525_vm14, %v514_v35, %v522_v49  ;;  %v532_v55 = vsel %vm525_vm14, %v522_v49, %v514_v35 }
 0x179   :  { %1357 = vmatprep.subr.bf16.mxu1 %v1356_v50  ;;  %v538_v61 = vmul.f32 %v1637_v44, %v528_v54  ;;  %v539_v63 = vmul.f32 %v1621_v32, %v532_v55 }
 0x17a   :  { %1359 = vmatpush1.bf16.msra.mxu1 %v1358_v47 }
 0x17b   :  { %v524_v57 = vpop.permute.xlu1 %523  ;;  %1361 = vmatprep.subr.bf16.mxu1 %v1360_v52 }
 0x17c   :  { %v529_v59 = vsel %vm525_vm14, %v516_v48, %v524_v57  ;;  %v533_v60 = vsel %vm525_vm14, %v524_v57, %v516_v48  ;;  %v665_v48 = vld [vmem:[%s1826_s6 + $0x8] sm:$0xff]  ;;  %s1450_s6 = smov 126  }
 0x17d   :  { %v540_v2 = vmul.f32 %v1637_v44, %v529_v59  ;;  %v541_v4 = vmul.f32 %v1621_v32, %v533_v60  ;;  %1321 = vmatmul.mubr.msk.f32.vlgmr.msra.gmra.mrb[0].mxu1 %vm342_vm9, %v337_v56 }
 0x17e   :  { %1363 = vmatpush1.bf16.msra.mxu1 %v1362_v58  ;;  %502 = vmatprep.mubr.f32.mxu1 %v1444_v1 }
 0x17f   :  { %v1366_v6 = vpack.c.bf16 %v540_v2, %v538_v61  ;;  %v1364_v7 = vpack.c.bf16 %v541_v4, %v539_v63 }
 0x181   :  { %1322 = vmatmul.mubr.msk.f32.gmra.mrb[2].mxu1 %vm342_vm9, %v338_v5  ;;  %1365 = vmatprep.subr.bf16.mxu1 %v1364_v7 }
 0x182   :  { %1367 = vmatpush1.bf16.msra.mxu1 %v1366_v6  ;;  %615 = vmatprep.mubr.f32.mxu1 %v1444_v1 }
 0x185   :  { %1325 = vmatmul.mubr.msk.f32.vlgmr.msra.gmra.mrb[0].mxu1 %vm342_vm9, %v1323_v8 }
 0x186   :  { %621 = vmatprep.mubr.f32.mxu1 %v1444_v1 }
 0x189   :  { %1326 = vmatmul.mubr.msk.f32.gmra.mrb[2].mxu1 %vm342_vm9, %v1324_v9 }
 0x18a   :  { %1264 = vmatprep.mubr.f32.mxu1 %v1444_v1 }
 0x258   :  { %v617_v11 = vpop.f32.mrb[0].mxu1 }
 0x259   :  { %v619_v12 = vpop.f32.mrb[1].mxu1  ;;  %v640_v13 = vmul.f32 %v617_v11, %v617_v11 }
 0x25a   :  { %v632_v14 = vadd.f32 %v619_v12, %v617_v11  ;;  %v641_v15 = vmul.f32 %v619_v12, %v619_v12 }
 0x25c   :  { %633 = vadd.xlane.f32.xlu0 %v632_v14  ;;  %v623_v16 = vpop.f32.mrb[2].mxu1  ;;  %v644_v17 = vadd.f32 %v641_v15, %v640_v13  ;;  %v256_v15 = vadd.s32 4294967294, %v1585_v62 }
 0x25d   :  { %v625_v18 = vpop.f32.mrb[3].mxu1  ;;  %v642_v19 = vmul.f32 %v623_v16, %v623_v16 }
 0x25e   :  { %v635_v20 = vadd.f32 %v625_v18, %v623_v16  ;;  %v643_v21 = vmul.f32 %v625_v18, %v625_v18  ;;  %vm258_vm0 = vcmp.ge.s32.totalorder %v256_v15, 0 }
 0x260   :  { %645 = vadd.xlane.f32.xlu0 %v644_v17  ;;  %636 = vadd.xlane.f32.xlu1 %v635_v20  ;;  %v647_v22 = vadd.f32 %v643_v21, %v642_v19 }
 0x264   :  { %648 = vadd.xlane.f32.xlu0 %v647_v22 }
 0x2e9   :  { %v634_v23 = vpop.xlane.xlu0 %633 }
 0x2ea   :  { %v638_v24 = vmul.f32 0.00390625, %v634_v23 }
 0x2ec   :  { %v652_v27 = vmul.f32 %v638_v24, %v638_v24 }
 0x2ed   :  { %v646_v25 = vpop.xlane.xlu0 %645  ;;  %v637_v26 = vpop.xlane.xlu1 %636 }
 0x2ee   :  { %v650_v28 = vmul.f32 0.00390625, %v646_v25  ;;  %v639_v29 = vmul.f32 0.00390625, %v637_v26 }
 0x2f0   :  { %v654_v30 = vsub.f32 %v650_v28, %v652_v27  ;;  %v653_v34 = vmul.f32 %v639_v29, %v639_v29 }
 0x2f1   :  { %v649_v31 = vpop.xlane.xlu0 %648 }
 0x2f2   :  { %v658_v33 = vadd.f32 1e-05, %v654_v30  ;;  %v651_v35 = vmul.f32 0.00390625, %v649_v31 }
 0x2f4   :  { %1414 = vrsqrt.f32 %v658_v33  ;;  %v655_v36 = vsub.f32 %v651_v35, %v653_v34 }
 0x2f6   :  { %v659_v37 = vadd.f32 1e-05, %v655_v36 }
 0x2f8   :  { %1416 = vrsqrt.f32 %v659_v37 }
 0x2fe   :  { %v1415_v39 = vpop.eup %1414 }
 0x2ff   :  { %v662_v40 = vmul.f32 %v1415_v39, %v656_v38 }
 0x301   :  { %672 = vperm.xlu1 %1413, %v662_v40   ;;  %v666_v43 = vmul.f32 %v662_v40, %v638_v24 }
 0x302   :  { %v1417_v45 = vpop.eup %1416 }
 0x303   :  { %v668_v46 = vsub.f32 %v664_v41, %v666_v43  ;;  %v663_v47 = vmul.f32 %v1417_v45, %v657_v42 }
 0x305   :  { %686 = vperm.xlu1 %1413, %v668_v46   ;;  %677 = vperm.xlu0 %1412, %v663_v47   ;;  %v667_v49 = vmul.f32 %v663_v47, %v639_v29  ;;  %v1309_v29 = vsel %vm258_vm0, 1.0, %v1444_v1  ;;  %v719_v47 = vld [vmem:[%s1827_s7] sm:$0xff] }
 0x307   :  { %v669_v50 = vsub.f32 %v665_v48, %v667_v49 }
 0x309   :  { %691 = vperm.xlu1 %1413, %v669_v50   ;;  %v293_v50 = vadd.s32 2, %v1588_v3 }
 0x30b   :  { %vm297_vm4 = vcmp.lt.s32.totalorder %v293_v50, 128 }
 0x380   :  { %v673_v51 = vpop.permute.xlu1 %672 }
 0x381   :  { %v680_v52 = vmul.f32 %v673_v51, %v617_v11  ;;  %v681_v55 = vmul.f32 %v673_v51, %v619_v12 }
 0x384   :  { %v678_v53 = vpop.permute.xlu0 %677  ;;  %v687_v54 = vpop.permute.xlu1 %686 }
 0x385   :  { %v694_v56 = vadd.f32 %v687_v54, %v680_v52  ;;  %v682_v57 = vmul.f32 %v678_v53, %v623_v16  ;;  %v683_v58 = vmul.f32 %v678_v53, %v625_v18  ;;  %v695_v59 = vadd.f32 %v687_v54, %v681_v55 }
 0x386   :  { %v257_v18 = vadd.s32 4294967294, %v1588_v3 }
 0x387   :  { %v1688_v60 = vmax.f32 %v694_v56, 0.0  ;;  %v1692_v4 = vmax.f32 %v695_v59, 0.0 }
 0x388   :  { %v692_v61 = vpop.permute.xlu1 %691  ;;  %vm259_vm1 = vcmp.ge.s32.totalorder %v257_v18, 0 }
 0x389   :  { %v696_v63 = vadd.f32 %v692_v61, %v682_v57  ;;  %v697_v2 = vadd.f32 %v692_v61, %v683_v58  ;;  %720 = vrot.lane.b32.xlu0 %v1688_v60, %s1447_s20  ;;  %v1310_v30 = vsel %vm259_vm1, 1.0, %v1444_v1 }
 0x38b   :  { %v1694_v5 = vmax.f32 %v696_v63, 0.0  ;;  %v1696_v6 = vmax.f32 %v697_v2, 0.0  ;;  %v1330_v63 = vld [vmem:[%s1827_s7 + $0x10] sm:$0xff] }
 0x38d   :  { %724 = vrot.lane.b32.xlu0 %v1692_v4, %s1447_s20  ;;  %722 = vrot.lane.b32.xlu1 %v1694_v5, %s1447_s20  ;;  %v1376_v7 = vpack.c.bf16 %v1696_v6, %v1692_v4  ;;  %v1378_v8 = vpack.c.bf16 %v1694_v5, %v1688_v60 }
 0x391   :  { %702 = vrot.lane.b32.xlu0 %v1688_v60, %s1449_s5  ;;  %726 = vrot.lane.b32.xlu1 %v1696_v6, %s1447_s20 }
 0x395   :  { %706 = vrot.lane.b32.xlu0 %v1692_v4, %s1449_s5  ;;  %704 = vrot.lane.b32.xlu1 %v1694_v5, %s1449_s5 }
 0x399   :  { %965 = vrot.lane.b32.xlu0 %v1688_v60, %s1448_s2  ;;  %708 = vrot.lane.b32.xlu1 %v1696_v6, %s1449_s5 }
 0x39d   :  { %969 = vrot.lane.b32.xlu0 %v1692_v4, %s1448_s2  ;;  %967 = vrot.lane.b32.xlu1 %v1694_v5, %s1448_s2 }
 0x3a1   :  { %1059 = vrot.lane.b32.xlu0 %v1688_v60, %s1450_s6  ;;  %971 = vrot.lane.b32.xlu1 %v1696_v6, %s1448_s2  ;;  %v1316_v60 = vsel %vm297_vm4, 1.0, %v1444_v1 }
 0x3a5   :  { %1063 = vrot.lane.b32.xlu0 %v1692_v4, %s1450_s6  ;;  %1061 = vrot.lane.b32.xlu1 %v1694_v5, %s1450_s6 }
 0x3a9   :  { %1065 = vrot.lane.b32.xlu1 %v1696_v6, %s1450_s6 }
 0x3fb   :  { %v721_v9 = vpop.permute.xlu0 %720 }
 0x3ff   :  { %v725_v11 = vpop.permute.xlu0 %724  ;;  %v723_v12 = vpop.permute.xlu1 %722 }
 0x400   :  { %v728_v13 = vsel %vm320_vm12, %v721_v9, %v725_v11  ;;  %v730_v14 = vsel %vm320_vm12, %v725_v11, %v721_v9 }
 0x401   :  { %v732_v21 = vmul.f32 %v1594_v0, %v730_v14  ;;  %v733_v22 = vmul.f32 %v1597_v10, %v728_v13  ;;  %v1332_v14 = vld [vmem:[%s1827_s7 + $0x18] sm:$0xff] }
 0x403   :  { %v703_v16 = vpop.permute.xlu0 %702  ;;  %v727_v17 = vpop.permute.xlu1 %726 }
 0x404   :  { %v729_v19 = vsel %vm320_vm12, %v723_v12, %v727_v17  ;;  %v731_v20 = vsel %vm320_vm12, %v727_v17, %v723_v12 }
 0x405   :  { %v734_v23 = vmul.f32 %v1594_v0, %v731_v20  ;;  %v735_v24 = vmul.f32 %v1597_v10, %v729_v19  ;;  %v1327_v0 = vld [vmem:[%s1827_s7 + $0x8] sm:$0xff] }
 0x407   :  { %v1370_v25 = vpack.c.bf16 %v734_v23, %v732_v21  ;;  %v707_v26 = vpop.permute.xlu0 %706  ;;  %v705_v27 = vpop.permute.xlu1 %704  ;;  %v1368_v28 = vpack.c.bf16 %v735_v24, %v733_v22 }
 0x408   :  { %v711_v31 = vsel %vm710_vm2, %v703_v16, %v707_v26  ;;  %v713_v33 = vsel %vm710_vm2, %v707_v26, %v703_v16  ;;  %v1334_v16 = vld [vmem:[%s1827_s7 + $0x20] sm:$0xff] }
 0x409   :  { %1369 = vmatprep.subr.bf16.mxu0 %v1368_v28  ;;  %v715_v37 = vmul.f32 %v1309_v29, %v713_v33  ;;  %v716_v38 = vmul.f32 %v1310_v30, %v711_v31  ;;  %v1166_v28 = vld [vmem:[%s1828_s8] sm:$0xff] }
 0x40a   :  { %1371 = vmatpush1.bf16.msra.mxu0 %v1370_v25  ;;  %v1170_v31 = vld [vmem:[%s1829_s9] sm:$0xff]  ;;  %s1451_s9 = smov [#allocation2]  }
 0x40b   :  { %v966_v10 = vpop.permute.xlu0 %965  ;;  %v709_v34 = vpop.permute.xlu1 %708 }
 0x40c   :  { %v712_v35 = vsel %vm710_vm2, %v705_v27, %v709_v34  ;;  %v714_v36 = vsel %vm710_vm2, %v709_v34, %v705_v27 }
 0x40d   :  { %v717_v39 = vmul.f32 %v1309_v29, %v714_v36  ;;  %v718_v40 = vmul.f32 %v1310_v30, %v712_v35  ;;  %1328 = vmatmul.mubr.msk.f32.vlgmr.msra.gmra.mrb[8].mxu0 %vm738_vm3, %v1327_v0  ;;  %v1190_v0 = vld [vmem:[%s1831_s11] sm:$0x3]  ;;  %s1289_s11 = sshll.u32 %s1451_s9, 4  ;;  %s1290_s11 = int_to_ptr.vmem [resolvable:$true] %s1289_s11 }
 0x40e   :  { %880 = vmatprep.mubr.f32.mxu0 %v1444_v1  ;;  %s1420_s1 = scalar_lea.vmem %s1290_s11, 64  ;;  %p1425_p1 = scmp.lt.s32.totalorder %s1290_s11, %s1290_s11 }
 0x40f   :  { %v1374_v41 = vpack.c.bf16 %v717_v39, %v715_v37  ;;  %v970_v42 = vpop.permute.xlu0 %969  ;;  %v968_v43 = vpop.permute.xlu1 %967  ;;  %v1372_v45 = vpack.c.bf16 %v718_v40, %v716_v38  ;;  %p1421_p0 = scmp.ne.s32.totalorder %s1290_s11, %s1420_s1  ;;  %p1426_p2 = scmp.lt.s32.totalorder %s1420_s1, %s1420_s1 }
 0x410   :  { %v975_v46 = vsel %vm525_vm14, %v970_v42, %v966_v10  ;;  %v973_v3 = vsel %vm525_vm14, %v966_v10, %v970_v42  ;;  %v1189_v42 = vld [vmem:[%s1830_s10] sm:$0x3] }
 0x411   :  { %1373 = vmatprep.subr.bf16.mxu0 %v1372_v45  ;;  %v978_v52 = vmul.f32 %v1621_v32, %v975_v46  ;;  %v977_v59 = vmul.f32 %v1637_v44, %v973_v3  ;;  %p1427_p3 = por %p1426_p2, %p1425_p1 }
 0x412   :  { %1375 = vmatpush1.bf16.msra.mxu0 %v1374_v41 }
 0x413   :  { %v1060_v48 = vpop.permute.xlu0 %1059  ;;  %1377 = vmatprep.subr.bf16.mxu0 %v1376_v7  ;;  %v972_v49 = vpop.permute.xlu1 %971  ;;  %p1428_p4 = pnand %p1427_p3, %p1421_p0 }
 0x414   :  { %v976_v51 = vsel %vm525_vm14, %v972_v49, %v968_v43  ;;  %v974_v53 = vsel %vm525_vm14, %v968_v43, %v972_v49 }
 0x415   :  { %v980_v54 = vmul.f32 %v1621_v32, %v976_v51  ;;  %1329 = vmatmul.mubr.msk.f32.vlgmr.msra.gmra.mrb[8].mxu0 %vm738_vm3, %v719_v47  ;;  %v979_v58 = vmul.f32 %v1637_v44, %v974_v53  ;;  %v292_v32 = vadd.s32 2, %v1585_v62 }
 0x416   :  { %1379 = vmatpush1.bf16.msra.mxu0 %v1378_v8  ;;  %956 = vmatprep.mubr.f32.mxu0 %v1444_v1 }
 0x417   :  { %v1064_v55 = vpop.permute.xlu0 %1063  ;;  %v1062_v56 = vpop.permute.xlu1 %1061  ;;  %v1380_v57 = vpack.c.bf16 %v980_v54, %v978_v52  ;;  %v1382_v4 = vpack.c.bf16 %v979_v58, %v977_v59  ;;  %vm296_vm6 = vcmp.lt.s32.totalorder %v292_v32, 128 }
 0x418   :  { %v1070_v61 = vsel %vm1067_vm5, %v1064_v55, %v1060_v48  ;;  %v1315_v8 = vsel %vm296_vm6, 1.0, %v1444_v1  ;;  %v1068_v9 = vsel %vm1067_vm5, %v1060_v48, %v1064_v55 }
 0x419   :  { %1381 = vmatprep.subr.bf16.mxu0 %v1380_v57  ;;  %v1073_v6 = vmul.f32 %v1316_v60, %v1070_v61  ;;  %v1072_v13 = vmul.f32 %v1315_v8, %v1068_v9 }
 0x41b   :  { %v1066_v2 = vpop.permute.xlu1 %1065 }
 0x41c   :  { %v1071_v5 = vsel %vm1067_vm5, %v1066_v2, %v1062_v56  ;;  %v1069_v7 = vsel %vm1067_vm5, %v1062_v56, %v1066_v2 }
 0x41d   :  { %v1075_v44 = vmul.f32 %v1316_v60, %v1071_v5  ;;  %1331 = vmatmul.mubr.msk.f32.vlgmr.msra.gmra.mrb[8].mxu0 %vm738_vm3, %v1330_v63  ;;  %v1074_v12 = vmul.f32 %v1315_v8, %v1069_v7 }
 0x41e   :  { %1383 = vmatpush1.bf16.msra.mxu0 %v1382_v4  ;;  %1050 = vmatprep.mubr.f32.mxu0 %v1444_v1 }
 0x41f   :  { %v1384_v11 = vpack.c.bf16 %v1075_v44, %v1073_v6  ;;  %v1386_v15 = vpack.c.bf16 %v1074_v12, %v1072_v13 }
 0x421   :  { %1385 = vmatprep.subr.bf16.mxu0 %v1384_v11 }
 0x425   :  { %1333 = vmatmul.mubr.msk.f32.vlgmr.msra.gmra.mrb[8].mxu0 %vm738_vm3, %v1332_v14 }
 0x426   :  { %1387 = vmatpush1.bf16.msra.mxu0 %v1386_v15  ;;  %1145 = vmatprep.mubr.f32.mxu0 %v1444_v1 }
 0x42d   :  { %1335 = vmatmul.mubr.msk.f32.vlgmr.msra.gmra.mrb[8].mxu0 %vm738_vm3, %v1334_v16 }
 0x500   :  { %v1147_v62 = vpop.f32.mrb[8].mxu0 }
 0x501   :  { %v1149_v17 = vpop.f32.mrb[9].mxu0  ;;  %v1158_v18 = vmul.f32 %v1147_v62, %v1147_v62 }
 0x502   :  { %v1159_v19 = vmul.f32 %v1149_v17, %v1149_v17  ;;  %v1154_v20 = vadd.f32 %v1149_v17, %v1147_v62 }
 0x504   :  { %1155 = vadd.xlane.f32.xlu0 %v1154_v20  ;;  %v1160_v21 = vadd.f32 %v1159_v19, %v1158_v18 }
 0x506   :  { %1161 = vadd.xlane.f32.xlu1 %v1160_v21 }
 0x591   :  { %v1156_v22 = vpop.xlane.xlu0 %1155 }
 0x592   :  { %v1157_v23 = vmul.f32 0.00390625, %v1156_v22 }
 0x593   :  { %v1162_v24 = vpop.xlane.xlu1 %1161 }
 0x594   :  { %v1164_v25 = vmul.f32 %v1157_v23, %v1157_v23  ;;  %v1163_v26 = vmul.f32 0.00390625, %v1162_v24 }
 0x596   :  { %v1165_v1 = vsub.f32 %v1163_v26, %v1164_v25 }
 0x598   :  { %v1167_v27 = vadd.f32 1e-05, %v1165_v1 }
 0x59a   :  { %1418 = vrsqrt.f32 %v1167_v27 }
 0x5a4   :  { %v1419_v29 = vpop.eup %1418 }
 0x5a5   :  { %v1169_v30 = vmul.f32 %v1419_v29, %v1166_v28 }
 0x5a7   :  { %1175 = vperm.xlu0 %1412, %v1169_v30   ;;  %v1171_v33 = vmul.f32 %v1169_v30, %v1157_v23 }
 0x5a9   :  { %v1172_v10 = vsub.f32 %v1170_v31, %v1171_v33 }
 0x5ab   :  { %1193 = vperm.xlu0 %1412, %v1190_v0   ;;  %1182 = vperm.xlu1 %1413, %v1172_v10  }
 0x626   :  { %v1176_v34 = vpop.permute.xlu0 %1175 }
 0x627   :  { %v1178_v35 = vmul.f32 %v1176_v34, %v1147_v62  ;;  %v1179_v36 = vmul.f32 %v1176_v34, %v1149_v17 }
 0x62a   :  { %v1183_v37 = vpop.permute.xlu1 %1182  ;;  %v1194_v43 = vpop.permute.xlu0 %1193 }
 0x62b   :  { %v1185_v38 = vadd.f32 %v1183_v37, %v1178_v35  ;;  %v1186_v39 = vadd.f32 %v1183_v37, %v1179_v36 }
 0x62d   :  { %v1187_v40 = vmax.f32 %v1185_v38, 0.0  ;;  %v1188_v41 = vmax.f32 %v1186_v39, 0.0 }
 0x62f   :  { %1200 = vmatprep.subr.mxu1 %v1188_v41 }
 0x630   :  { %1201 = vmatpush1.msra.mxu1 %v1187_v40 }
 0x631   :  { %1336 = vmatmul.mubr.msk.f32.vlgmr.msra.gmra.mrb[4].mxu1 %vm1196_vm7, %v1189_v42 }
 0x704   :  { %v1266_v45 = vpop.f32.mrb[4].mxu1 }
 0x705   :  { %v1267_v46 = vadd.f32 %v1266_v45, %v1194_v43  ;;  %v1268_v47 = vpop.f32.mrb[5].mxu1 }
 0x706   :  { %v1269_v48 = vadd.f32 %v1268_v47, %v1194_v43 }
 0x708   :  { %v1273_v49 = vcombine.low %v1267_v46, %v1269_v48 }
 0x70a   :  { %1337 = vst.sshfl [vmem:[#allocation2] sm:$0x33 pattern:$0x76325410] %v1273_v49 }
 0x70b   :  { %1431 = shalt.err (!%p1428_p4)
}
 0x70c   :  { %s1432_s14 = scalar_lea.hbm %s1832_s12, 64 }
 0x70d   :  { %p1433_p5 = scmp.ne.s32.totalorder %s1832_s12, %s1432_s14  ;;  %p1436_p6 = scmp.lt.u32.totalorder %s1432_s14, %s1832_s12 }
 0x70f   :  { %p1438_p7 = pnand %p1436_p6, %p1433_p5 }
 0x711   :  { %1441 = shalt.err (!%p1438_p7)
}
 0x712   :  { %1292 = dma.vmem_to_hbm [thread:$0]  %s1290_s11, 64, %s1832_s12, [#allocation3]  }
 0x713   :  { %1442 = dma.done.wait [#allocation3], 64  }
 0x714   :  { %1443 = vsyncadd [#allocation3], 4294967232 }
 0x715   :  { %1296 = vsyncpa [#allocation3], 1 }

</bundles_post_ra>
